<compile_context>
chip_gen: v7x
topology: tpu7x:2x2x1
jax: 0.10.0
libtpu: 0.0.40
codegen_flags: <defaults>
</compile_context>

<pallas_src>
import functools

import jax
import jax.numpy as jnp
from jax.experimental import pallas as pl
from jax.experimental.pallas import tpu as pltpu

LN_EPS = 1e-5  # PyTorch nn.LayerNorm default eps


def _make_fused_fcns_kernel(n_layers):
    """Builds a kernel computing h = relu(layernorm(h @ W_i + b_i)) for all layers."""

    def kernel(*refs):
        # refs = (x_ref, w0, b0, w1, b1, ..., w{n-1}, b{n-1}, o_ref)
        x_ref = refs[0]
        o_ref = refs[-1]
        h = x_ref[...]
        for i in range(n_layers):  # unrolled Python loop; traced once
            w_ref = refs[1 + 2 * i]
            b_ref = refs[2 + 2 * i]
            # MXU matmul + bias (bias read exactly once per layer).
            h = jnp.dot(h, w_ref[...], preferred_element_type=jnp.float32) + b_ref[...]
            # LayerNorm over last dim, no affine (biased variance, like PyTorch).
            mean = jnp.mean(h, axis=-1, keepdims=True)
            c = h - mean
            var = jnp.mean(c * c, axis=-1, keepdims=True)
            h = c * jax.lax.rsqrt(var + LN_EPS)
            # ReLU
            h = jnp.maximum(h, 0.0)
        o_ref[...] = h.astype(o_ref.dtype)

    return kernel


@functools.partial(jax.jit, static_argnames=("max_batch_tile",))
def fcns_forward(x, params, max_batch_tile=256):
    """FCNs.forward fused into one Pallas kernel.

    x: (B, s_dim) f32
    params: list of (w, b) with w: (Din, Dout) f32, b: (1, Dout) f32
    """
    B, Din = x.shape
    n_layers = len(params)
    Dout = params[-1][0].shape[1]

    # Pick a batch tile: multiple of 8, <= max_batch_tile; pad B if needed.
    TB = min(B, max_batch_tile)
    TB = max(8, (TB // 8) * 8)
    pad = (-B) % TB
    if pad:
        x = jnp.pad(x, ((0, pad), (0, 0)))
    Bp = B + pad
    grid = (Bp // TB,)

    in_specs = [pl.BlockSpec((TB, Din), lambda i: (i, 0))]
    flat_args = []
    for w, b in params:
        din, dout = w.shape
        # Constant index_map -> weights/bias stay VMEM-resident across grid steps.
        in_specs.append(pl.BlockSpec((din, dout), lambda i: (0, 0)))
        in_specs.append(pl.BlockSpec((1, dout), lambda i: (0, 0)))
        flat_args.extend((w, b))

    out_spec = pl.BlockSpec((TB, Dout), lambda i: (i, 0))

    flops = 2 * Bp * sum(int(w.shape[0] * w.shape[1]) for w, _ in params)
    bytes_accessed = 4 * (
        int(x.size) + Bp * Dout + sum(int(w.size + b.size) for w, b in params)
    )
    cost = pl.CostEstimate(
        flops=flops,
        transcendentals=Bp * n_layers,  # one rsqrt per row per layer
        bytes_accessed=bytes_accessed,
    )

    out = pl.pallas_call(
        _make_fused_fcns_kernel(n_layers),
        out_shape=jax.ShapeDtypeStruct((Bp, Dout), jnp.float32),
        grid=grid,
        in_specs=in_specs,
        out_specs=out_spec,
        compiler_params=pltpu.CompilerParams(
            dimension_semantics=("parallel",),  # batch axis shards across TCs on v7x
            vmem_limit_bytes=32 * 1024 * 1024,
        ),
        cost_estimate=cost,
    )(x, *flat_args)

    if pad:
        out = out[:B]
    return out


def init_fcns_params(key, s_dim, h_dims):
    """Deterministic init mirroring nn.Linear's default (uniform +-1/sqrt(fan_in))."""
    dims = [s_dim] + list(h_dims)
    params = []
    for i in range(len(dims) - 1):
        key, kw, kb = jax.random.split(key, 3)
        fan_in = dims[i]
        bound = 1.0 / jnp.sqrt(jnp.float32(fan_in))
        # Stored as (Din, Dout): transpose of PyTorch's (Dout, Din) weight.
        w = jax.random.uniform(kw, (dims[i], dims[i + 1]), jnp.float32, -bound, bound)
        b = jax.random.uniform(kb, (1, dims[i + 1]), jnp.float32, -bound, bound)
        params.append((w, b))
    return params


def fcns_reference(x, params):
    """Pure-JAX reference of FCNs.forward for correctness checking."""
    h = x
    for w, b in params:
        h = h @ w + b
        mean = jnp.mean(h, axis=-1, keepdims=True)
        c = h - mean
        var = jnp.mean(c * c, axis=-1, keepdims=True)
        h = jnp.maximum(c * jax.lax.rsqrt(var + LN_EPS), 0.0)
    return h


if __name__ == "__main__":
    # Small shapes consistent with the module: batch=8, s_dim=16, 5 hidden layers of 32.
    B, S_DIM = 8, 16
    H_DIMS = [32] * 5

    key = jax.random.PRNGKey(0)
    key, kx = jax.random.split(key)
    x = jax.random.normal(kx, (B, S_DIM), dtype=jnp.float32)

    params = init_fcns_params(key, S_DIM, H_DIMS)

    out = fcns_forward(x, params)
    out = jax.block_until_ready(out)

    assert out.shape == (B, H_DIMS[-1]), out.shape
    assert out.dtype == jnp.float32

    ref = fcns_reference(x, params)
    assert jnp.allclose(out, ref, atol=1e-5, rtol=1e-5), float(
        jnp.max(jnp.abs(out - ref))
    )

    print("KERNEL_OK")
</pallas_src>

<mosaic_0001>
module attributes {stable_mosaic.version = 11 : i64} {
  func.func @kernel(%arg0: i32, %arg1: memref<8x16xf32, #tpu.memory_space<vmem>>, %arg2: memref<16x32xf32, #tpu.memory_space<vmem>>, %arg3: memref<1x32xf32, #tpu.memory_space<vmem>>, %arg4: memref<32x32xf32, #tpu.memory_space<vmem>>, %arg5: memref<1x32xf32, #tpu.memory_space<vmem>>, %arg6: memref<32x32xf32, #tpu.memory_space<vmem>>, %arg7: memref<1x32xf32, #tpu.memory_space<vmem>>, %arg8: memref<32x32xf32, #tpu.memory_space<vmem>>, %arg9: memref<1x32xf32, #tpu.memory_space<vmem>>, %arg10: memref<32x32xf32, #tpu.memory_space<vmem>>, %arg11: memref<1x32xf32, #tpu.memory_space<vmem>>, %arg12: memref<8x32xf32, #tpu.memory_space<vmem>>) attributes {dimension_semantics = [#tpu.dimension_semantics<parallel>], iteration_bounds = array<i64: 1>, scalar_prefetch = 0 : i64, scratch_operands = 0 : i64, tpu.core_type = #tpu.core_type<tc>, window_params = [{transform_indices = @transform_0, window_bounds = array<i64: 8, 16>}, {pipeline_mode = #tpu.pipeline_mode<synchronous>, transform_indices = @transform_1, window_bounds = array<i64: 16, 32>}, {pipeline_mode = #tpu.pipeline_mode<synchronous>, transform_indices = @transform_2, window_bounds = array<i64: 1, 32>}, {pipeline_mode = #tpu.pipeline_mode<synchronous>, transform_indices = @transform_3, window_bounds = array<i64: 32, 32>}, {pipeline_mode = #tpu.pipeline_mode<synchronous>, transform_indices = @transform_4, window_bounds = array<i64: 1, 32>}, {pipeline_mode = #tpu.pipeline_mode<synchronous>, transform_indices = @transform_5, window_bounds = array<i64: 32, 32>}, {pipeline_mode = #tpu.pipeline_mode<synchronous>, transform_indices = @transform_6, window_bounds = array<i64: 1, 32>}, {pipeline_mode = #tpu.pipeline_mode<synchronous>, transform_indices = @transform_7, window_bounds = array<i64: 32, 32>}, {pipeline_mode = #tpu.pipeline_mode<synchronous>, transform_indices = @transform_8, window_bounds = array<i64: 1, 32>}, {pipeline_mode = #tpu.pipeline_mode<synchronous>, transform_indices = @transform_9, window_bounds = array<i64: 32, 32>}, {pipeline_mode = #tpu.pipeline_mode<synchronous>, transform_indices = @transform_10, window_bounds = array<i64: 1, 32>}, {transform_indices = @transform_11, window_bounds = array<i64: 8, 32>}]} {
    %c0 = arith.constant 0 : index
    %c0_0 = arith.constant 0 : index
    %0 = vector.load %arg1[%c0, %c0_0] : memref<8x16xf32, #tpu.memory_space<vmem>>, vector<8x16xf32>
    %c0_1 = arith.constant 0 : index
    %c0_2 = arith.constant 0 : index
    %1 = vector.load %arg2[%c0_1, %c0_2] : memref<16x32xf32, #tpu.memory_space<vmem>>, vector<16x32xf32>
    %cst = arith.constant dense<0.000000e+00> : vector<8x32xf32>
    %2 = tpu.matmul %0, %1, %cst {dimension_numbers = #tpu.dot_dimension_numbers<[1], [0], [0], [1], [0, 0, 1, 1], [], []>} : vector<8x16xf32>, vector<16x32xf32>, vector<8x32xf32> -> vector<8x32xf32>
    %c0_3 = arith.constant 0 : index
    %c0_4 = arith.constant 0 : index
    %3 = vector.load %arg3[%c0_3, %c0_4] : memref<1x32xf32, #tpu.memory_space<vmem>>, vector<1x32xf32>
    %4 = vector.broadcast %3 : vector<1x32xf32> to vector<8x32xf32>
    %5 = arith.addf %2, %4 : vector<8x32xf32>
    %cst_5 = arith.constant dense<0.000000e+00> : vector<8xf32>
    %6 = vector.multi_reduction <add>, %5, %cst_5 [1] : vector<8x32xf32> to vector<8xf32>
    %7 = vector.shape_cast %6 : vector<8xf32> to vector<8x1xf32>
    %cst_6 = arith.constant 3.200000e+01 : f32
    %8 = vector.broadcast %cst_6 : f32 to vector<8x1xf32>
    %9 = arith.divf %7, %8 : vector<8x1xf32>
    %10 = vector.broadcast %9 : vector<8x1xf32> to vector<8x32xf32>
    %11 = arith.subf %5, %10 : vector<8x32xf32>
    %12 = arith.mulf %11, %11 : vector<8x32xf32>
    %cst_7 = arith.constant dense<0.000000e+00> : vector<8xf32>
    %13 = vector.multi_reduction <add>, %12, %cst_7 [1] : vector<8x32xf32> to vector<8xf32>
    %14 = vector.shape_cast %13 : vector<8xf32> to vector<8x1xf32>
    %cst_8 = arith.constant 3.200000e+01 : f32
    %15 = vector.broadcast %cst_8 : f32 to vector<8x1xf32>
    %16 = arith.divf %14, %15 : vector<8x1xf32>
    %cst_9 = arith.constant 9.99999974E-6 : f32
    %17 = vector.broadcast %cst_9 : f32 to vector<8x1xf32>
    %18 = arith.addf %16, %17 : vector<8x1xf32>
    %19 = math.rsqrt %18 : vector<8x1xf32>
    %20 = vector.broadcast %19 : vector<8x1xf32> to vector<8x32xf32>
    %21 = arith.mulf %11, %20 : vector<8x32xf32>
    %cst_10 = arith.constant 0.000000e+00 : f32
    %22 = vector.broadcast %cst_10 : f32 to vector<8x32xf32>
    %23 = arith.maximumf %21, %22 : vector<8x32xf32>
    %c0_11 = arith.constant 0 : index
    %c0_12 = arith.constant 0 : index
    %24 = vector.load %arg4[%c0_11, %c0_12] : memref<32x32xf32, #tpu.memory_space<vmem>>, vector<32x32xf32>
    %cst_13 = arith.constant dense<0.000000e+00> : vector<8x32xf32>
    %25 = tpu.matmul %23, %24, %cst_13 {dimension_numbers = #tpu.dot_dimension_numbers<[1], [0], [0], [1], [0, 0, 1, 1], [], []>} : vector<8x32xf32>, vector<32x32xf32>, vector<8x32xf32> -> vector<8x32xf32>
    %c0_14 = arith.constant 0 : index
    %c0_15 = arith.constant 0 : index
    %26 = vector.load %arg5[%c0_14, %c0_15] : memref<1x32xf32, #tpu.memory_space<vmem>>, vector<1x32xf32>
    %27 = vector.broadcast %26 : vector<1x32xf32> to vector<8x32xf32>
    %28 = arith.addf %25, %27 : vector<8x32xf32>
    %cst_16 = arith.constant dense<0.000000e+00> : vector<8xf32>
    %29 = vector.multi_reduction <add>, %28, %cst_16 [1] : vector<8x32xf32> to vector<8xf32>
    %30 = vector.shape_cast %29 : vector<8xf32> to vector<8x1xf32>
    %cst_17 = arith.constant 3.200000e+01 : f32
    %31 = vector.broadcast %cst_17 : f32 to vector<8x1xf32>
    %32 = arith.divf %30, %31 : vector<8x1xf32>
    %33 = vector.broadcast %32 : vector<8x1xf32> to vector<8x32xf32>
    %34 = arith.subf %28, %33 : vector<8x32xf32>
    %35 = arith.mulf %34, %34 : vector<8x32xf32>
    %cst_18 = arith.constant dense<0.000000e+00> : vector<8xf32>
    %36 = vector.multi_reduction <add>, %35, %cst_18 [1] : vector<8x32xf32> to vector<8xf32>
    %37 = vector.shape_cast %36 : vector<8xf32> to vector<8x1xf32>
    %cst_19 = arith.constant 3.200000e+01 : f32
    %38 = vector.broadcast %cst_19 : f32 to vector<8x1xf32>
    %39 = arith.divf %37, %38 : vector<8x1xf32>
    %cst_20 = arith.constant 9.99999974E-6 : f32
    %40 = vector.broadcast %cst_20 : f32 to vector<8x1xf32>
    %41 = arith.addf %39, %40 : vector<8x1xf32>
    %42 = math.rsqrt %41 : vector<8x1xf32>
    %43 = vector.broadcast %42 : vector<8x1xf32> to vector<8x32xf32>
    %44 = arith.mulf %34, %43 : vector<8x32xf32>
    %cst_21 = arith.constant 0.000000e+00 : f32
    %45 = vector.broadcast %cst_21 : f32 to vector<8x32xf32>
    %46 = arith.maximumf %44, %45 : vector<8x32xf32>
    %c0_22 = arith.constant 0 : index
    %c0_23 = arith.constant 0 : index
    %47 = vector.load %arg6[%c0_22, %c0_23] : memref<32x32xf32, #tpu.memory_space<vmem>>, vector<32x32xf32>
    %cst_24 = arith.constant dense<0.000000e+00> : vector<8x32xf32>
    %48 = tpu.matmul %46, %47, %cst_24 {dimension_numbers = #tpu.dot_dimension_numbers<[1], [0], [0], [1], [0, 0, 1, 1], [], []>} : vector<8x32xf32>, vector<32x32xf32>, vector<8x32xf32> -> vector<8x32xf32>
    %c0_25 = arith.constant 0 : index
    %c0_26 = arith.constant 0 : index
    %49 = vector.load %arg7[%c0_25, %c0_26] : memref<1x32xf32, #tpu.memory_space<vmem>>, vector<1x32xf32>
    %50 = vector.broadcast %49 : vector<1x32xf32> to vector<8x32xf32>
    %51 = arith.addf %48, %50 : vector<8x32xf32>
    %cst_27 = arith.constant dense<0.000000e+00> : vector<8xf32>
    %52 = vector.multi_reduction <add>, %51, %cst_27 [1] : vector<8x32xf32> to vector<8xf32>
    %53 = vector.shape_cast %52 : vector<8xf32> to vector<8x1xf32>
    %cst_28 = arith.constant 3.200000e+01 : f32
    %54 = vector.broadcast %cst_28 : f32 to vector<8x1xf32>
    %55 = arith.divf %53, %54 : vector<8x1xf32>
    %56 = vector.broadcast %55 : vector<8x1xf32> to vector<8x32xf32>
    %57 = arith.subf %51, %56 : vector<8x32xf32>
    %58 = arith.mulf %57, %57 : vector<8x32xf32>
    %cst_29 = arith.constant dense<0.000000e+00> : vector<8xf32>
    %59 = vector.multi_reduction <add>, %58, %cst_29 [1] : vector<8x32xf32> to vector<8xf32>
    %60 = vector.shape_cast %59 : vector<8xf32> to vector<8x1xf32>
    %cst_30 = arith.constant 3.200000e+01 : f32
    %61 = vector.broadcast %cst_30 : f32 to vector<8x1xf32>
    %62 = arith.divf %60, %61 : vector<8x1xf32>
    %cst_31 = arith.constant 9.99999974E-6 : f32
    %63 = vector.broadcast %cst_31 : f32 to vector<8x1xf32>
    %64 = arith.addf %62, %63 : vector<8x1xf32>
    %65 = math.rsqrt %64 : vector<8x1xf32>
    %66 = vector.broadcast %65 : vector<8x1xf32> to vector<8x32xf32>
    %67 = arith.mulf %57, %66 : vector<8x32xf32>
    %cst_32 = arith.constant 0.000000e+00 : f32
    %68 = vector.broadcast %cst_32 : f32 to vector<8x32xf32>
    %69 = arith.maximumf %67, %68 : vector<8x32xf32>
    %c0_33 = arith.constant 0 : index
    %c0_34 = arith.constant 0 : index
    %70 = vector.load %arg8[%c0_33, %c0_34] : memref<32x32xf32, #tpu.memory_space<vmem>>, vector<32x32xf32>
    %cst_35 = arith.constant dense<0.000000e+00> : vector<8x32xf32>
    %71 = tpu.matmul %69, %70, %cst_35 {dimension_numbers = #tpu.dot_dimension_numbers<[1], [0], [0], [1], [0, 0, 1, 1], [], []>} : vector<8x32xf32>, vector<32x32xf32>, vector<8x32xf32> -> vector<8x32xf32>
    %c0_36 = arith.constant 0 : index
    %c0_37 = arith.constant 0 : index
    %72 = vector.load %arg9[%c0_36, %c0_37] : memref<1x32xf32, #tpu.memory_space<vmem>>, vector<1x32xf32>
    %73 = vector.broadcast %72 : vector<1x32xf32> to vector<8x32xf32>
    %74 = arith.addf %71, %73 : vector<8x32xf32>
    %cst_38 = arith.constant dense<0.000000e+00> : vector<8xf32>
    %75 = vector.multi_reduction <add>, %74, %cst_38 [1] : vector<8x32xf32> to vector<8xf32>
    %76 = vector.shape_cast %75 : vector<8xf32> to vector<8x1xf32>
    %cst_39 = arith.constant 3.200000e+01 : f32
    %77 = vector.broadcast %cst_39 : f32 to vector<8x1xf32>
    %78 = arith.divf %76, %77 : vector<8x1xf32>
    %79 = vector.broadcast %78 : vector<8x1xf32> to vector<8x32xf32>
    %80 = arith.subf %74, %79 : vector<8x32xf32>
    %81 = arith.mulf %80, %80 : vector<8x32xf32>
    %cst_40 = arith.constant dense<0.000000e+00> : vector<8xf32>
    %82 = vector.multi_reduction <add>, %81, %cst_40 [1] : vector<8x32xf32> to vector<8xf32>
    %83 = vector.shape_cast %82 : vector<8xf32> to vector<8x1xf32>
    %cst_41 = arith.constant 3.200000e+01 : f32
    %84 = vector.broadcast %cst_41 : f32 to vector<8x1xf32>
    %85 = arith.divf %83, %84 : vector<8x1xf32>
    %cst_42 = arith.constant 9.99999974E-6 : f32
    %86 = vector.broadcast %cst_42 : f32 to vector<8x1xf32>
    %87 = arith.addf %85, %86 : vector<8x1xf32>
    %88 = math.rsqrt %87 : vector<8x1xf32>
    %89 = vector.broadcast %88 : vector<8x1xf32> to vector<8x32xf32>
    %90 = arith.mulf %80, %89 : vector<8x32xf32>
    %cst_43 = arith.constant 0.000000e+00 : f32
    %91 = vector.broadcast %cst_43 : f32 to vector<8x32xf32>
    %92 = arith.maximumf %90, %91 : vector<8x32xf32>
    %c0_44 = arith.constant 0 : index
    %c0_45 = arith.constant 0 : index
    %93 = vector.load %arg10[%c0_44, %c0_45] : memref<32x32xf32, #tpu.memory_space<vmem>>, vector<32x32xf32>
    %cst_46 = arith.constant dense<0.000000e+00> : vector<8x32xf32>
    %94 = tpu.matmul %92, %93, %cst_46 {dimension_numbers = #tpu.dot_dimension_numbers<[1], [0], [0], [1], [0, 0, 1, 1], [], []>} : vector<8x32xf32>, vector<32x32xf32>, vector<8x32xf32> -> vector<8x32xf32>
    %c0_47 = arith.constant 0 : index
    %c0_48 = arith.constant 0 : index
    %95 = vector.load %arg11[%c0_47, %c0_48] : memref<1x32xf32, #tpu.memory_space<vmem>>, vector<1x32xf32>
    %96 = vector.broadcast %95 : vector<1x32xf32> to vector<8x32xf32>
    %97 = arith.addf %94, %96 : vector<8x32xf32>
    %cst_49 = arith.constant dense<0.000000e+00> : vector<8xf32>
    %98 = vector.multi_reduction <add>, %97, %cst_49 [1] : vector<8x32xf32> to vector<8xf32>
    %99 = vector.shape_cast %98 : vector<8xf32> to vector<8x1xf32>
    %cst_50 = arith.constant 3.200000e+01 : f32
    %100 = vector.broadcast %cst_50 : f32 to vector<8x1xf32>
    %101 = arith.divf %99, %100 : vector<8x1xf32>
    %102 = vector.broadcast %101 : vector<8x1xf32> to vector<8x32xf32>
    %103 = arith.subf %97, %102 : vector<8x32xf32>
    %104 = arith.mulf %103, %103 : vector<8x32xf32>
    %cst_51 = arith.constant dense<0.000000e+00> : vector<8xf32>
    %105 = vector.multi_reduction <add>, %104, %cst_51 [1] : vector<8x32xf32> to vector<8xf32>
    %106 = vector.shape_cast %105 : vector<8xf32> to vector<8x1xf32>
    %cst_52 = arith.constant 3.200000e+01 : f32
    %107 = vector.broadcast %cst_52 : f32 to vector<8x1xf32>
    %108 = arith.divf %106, %107 : vector<8x1xf32>
    %cst_53 = arith.constant 9.99999974E-6 : f32
    %109 = vector.broadcast %cst_53 : f32 to vector<8x1xf32>
    %110 = arith.addf %108, %109 : vector<8x1xf32>
    %111 = math.rsqrt %110 : vector<8x1xf32>
    %112 = vector.broadcast %111 : vector<8x1xf32> to vector<8x32xf32>
    %113 = arith.mulf %103, %112 : vector<8x32xf32>
    %cst_54 = arith.constant 0.000000e+00 : f32
    %114 = vector.broadcast %cst_54 : f32 to vector<8x32xf32>
    %115 = arith.maximumf %113, %114 : vector<8x32xf32>
    %c0_55 = arith.constant 0 : index
    %c0_56 = arith.constant 0 : index
    %116 = vector.load %arg12[%c0_55, %c0_56] : memref<8x32xf32, #tpu.memory_space<vmem>>, vector<8x32xf32>
    tpu.vector_store %arg12[%c0_55, %c0_56], %115 {strides = array<i32>} : memref<8x32xf32, #tpu.memory_space<vmem>>, vector<8x32xf32>,
    return
  }
  func.func @transform_0(%arg0: i32) -> (i32, i32) {
    %c0_i32 = arith.constant 0 : i32
    %c0_i32_0 = arith.constant 0 : i32
    return %arg0, %c0_i32 : i32, i32
  }
  func.func @transform_1(%arg0: i32) -> (i32, i32) {
    %c0_i32 = arith.constant 0 : i32
    %c0_i32_0 = arith.constant 0 : i32
    %c0_i32_1 = arith.constant 0 : i32
    return %c0_i32, %c0_i32_0 : i32, i32
  }
  func.func @transform_2(%arg0: i32) -> (i32, i32) {
    %c0_i32 = arith.constant 0 : i32
    %c0_i32_0 = arith.constant 0 : i32
    %c0_i32_1 = arith.constant 0 : i32
    return %c0_i32, %c0_i32_0 : i32, i32
  }
  func.func @transform_3(%arg0: i32) -> (i32, i32) {
    %c0_i32 = arith.constant 0 : i32
    %c0_i32_0 = arith.constant 0 : i32
    %c0_i32_1 = arith.constant 0 : i32
    return %c0_i32, %c0_i32_0 : i32, i32
  }
  func.func @transform_4(%arg0: i32) -> (i32, i32) {
    %c0_i32 = arith.constant 0 : i32
    %c0_i32_0 = arith.constant 0 : i32
    %c0_i32_1 = arith.constant 0 : i32
    return %c0_i32, %c0_i32_0 : i32, i32
  }
  func.func @transform_5(%arg0: i32) -> (i32, i32) {
    %c0_i32 = arith.constant 0 : i32
    %c0_i32_0 = arith.constant 0 : i32
    %c0_i32_1 = arith.constant 0 : i32
    return %c0_i32, %c0_i32_0 : i32, i32
  }
  func.func @transform_6(%arg0: i32) -> (i32, i32) {
    %c0_i32 = arith.constant 0 : i32
    %c0_i32_0 = arith.constant 0 : i32
    %c0_i32_1 = arith.constant 0 : i32
    return %c0_i32, %c0_i32_0 : i32, i32
  }
  func.func @transform_7(%arg0: i32) -> (i32, i32) {
    %c0_i32 = arith.constant 0 : i32
    %c0_i32_0 = arith.constant 0 : i32
    %c0_i32_1 = arith.constant 0 : i32
    return %c0_i32, %c0_i32_0 : i32, i32
  }
  func.func @transform_8(%arg0: i32) -> (i32, i32) {
    %c0_i32 = arith.constant 0 : i32
    %c0_i32_0 = arith.constant 0 : i32
    %c0_i32_1 = arith.constant 0 : i32
    return %c0_i32, %c0_i32_0 : i32, i32
  }
  func.func @transform_9(%arg0: i32) -> (i32, i32) {
    %c0_i32 = arith.constant 0 : i32
    %c0_i32_0 = arith.constant 0 : i32
    %c0_i32_1 = arith.constant 0 : i32
    return %c0_i32, %c0_i32_0 : i32, i32
  }
  func.func @transform_10(%arg0: i32) -> (i32, i32) {
    %c0_i32 = arith.constant 0 : i32
    %c0_i32_0 = arith.constant 0 : i32
    %c0_i32_1 = arith.constant 0 : i32
    return %c0_i32, %c0_i32_0 : i32, i32
  }
  func.func @transform_11(%arg0: i32) -> (i32, i32) {
    %c0_i32 = arith.constant 0 : i32
    %c0_i32_0 = arith.constant 0 : i32
    return %arg0, %c0_i32 : i32, i32
  }
}

</mosaic_0001>

<bundles_post_ra>
// kernel: fcns_forward.1
= control target key start
LH: loop header
LB: loop body
LE: loop exit
PB: predicated region body
PF: predicated region fallthrough
CT: control target
= control target key end

     0   :  { %16 = vsyncpa [#allocation3], 0  ;;  %s1195_s0 = inlined_call_operand.hbm [shape: f32[8,16], index: 0, kind: input, shape index: {}]   ;;  %s1196_s1 = inlined_call_operand.hbm [shape: f32[16,32], index: 1, kind: input, shape index: {}]   ;;  %s1197_s2 = inlined_call_operand.vmem [shape: f32[1,32], index: 2, kind: input, shape index: {}]   ;;  %s1198_s3 = inlined_call_operand.hbm [shape: f32[32,32], index: 3, kind: input, shape index: {}]   ;;  %s1199_s4 = inlined_call_operand.vmem [shape: f32[1,32], index: 4, kind: input, shape index: {}]   ;;  %s1200_s5 = inlined_call_operand.hbm [shape: f32[32,32], index: 5, kind: input, shape index: {}]   ;;  %s1201_s6 = inlined_call_operand.hbm [shape: f32[1,32], index: 6, kind: input, shape index: {}]   ;;  %s1202_s7 = inlined_call_operand.hbm [shape: f32[32,32], index: 7, kind: input, shape index: {}]   ;;  %s1203_s8 = inlined_call_operand.hbm [shape: f32[1,32], index: 8, kind: input, shape index: {}]   ;;  %s1204_s9 = inlined_call_operand.vmem [shape: f32[32,32], index: 9, kind: input, shape index: {}]   ;;  %s1205_s10 = inlined_call_operand.vmem [shape: f32[1,32], index: 10, kind: input, shape index: {}]   ;;  %s1206_s11 = inlined_call_operand.hbm [shape: f32[8,32], index: 11, kind: output, shape index: {}]  }
   0x1   :  { %17 = vsyncpa [#allocation6], 0 }
   0x2   :  { %18 = vsyncpa [#allocation9], 0 }
   0x3   :  { %19 = vsyncpa [#allocation12], 0 }
   0x4   :  { %20 = vsyncpa [#allocation4], 0  ;;  %s959_s17 = smov [#allocation5]   ;;  %s773_s21 = scalar_lea.hbm %s1196_s1, 256 }
   0x5   :  { %s36_s18 = sshll.u32 %s959_s17, 4  ;;  %p774_p0 = scmp.ne.s32.totalorder %s1196_s1, %s773_s21  ;;  %s37_s18 = int_to_ptr.vmem [resolvable:$true] %s36_s18 }
   0x6   :  { %p777_p1 = scmp.lt.u32.totalorder %s773_s21, %s1196_s1 }
   0x8   :  { %p779_p2 = pnand %p777_p1, %p774_p0 }
   0xa   :  { %782 = shalt.err (!%p779_p2)
}
   0xb   :  { %s783_s26 = scalar_lea.vmem %s37_s18, 256  ;;  %p788_p4 = scmp.lt.s32.totalorder %s37_s18, %s37_s18 }
   0xc   :  { %p784_p3 = scmp.ne.s32.totalorder %s37_s18, %s783_s26  ;;  %p789_p5 = scmp.lt.s32.totalorder %s783_s26, %s783_s26 }
   0xe   :  { %p790_p6 = por %p789_p5, %p788_p4 }
  0x10   :  { %p791_p7 = pnand %p790_p6, %p784_p3 }
  0x12   :  { %794 = shalt.err (!%p791_p7)
}
  0x13   :  { %s960_s27 = smov 128   ;;  %s961_s28 = smov 8  }
  0x14   :  { %42 = dma.hbm_to_vmem [thread:$0]  %s1196_s1, 256, %s37_s18, [#allocation6], %s960_s27, %s960_s27, %s961_s28  }
  0x15   :  { %s962_s12 = smov [#allocation8]   ;;  %s963_s14 = smov [#allocation11]  }
  0x16   :  { %s64_s13 = sshll.u32 %s962_s12, 4  ;;  %s86_s15 = sshll.u32 %s963_s14, 4  ;;  %s65_s13 = int_to_ptr.vmem [resolvable:$true] %s64_s13  ;;  %s87_s15 = int_to_ptr.vmem [resolvable:$true] %s86_s15 }
  0x17   :  { %s795_s19 = scalar_lea.hbm %s1200_s5, 512 }
  0x18   :  { %p796_p8 = scmp.ne.s32.totalorder %s1200_s5, %s795_s19  ;;  %p799_p9 = scmp.lt.u32.totalorder %s795_s19, %s1200_s5 }
  0x1a   :  { %p801_p10 = pnand %p799_p9, %p796_p8 }
  0x1c   :  { %804 = shalt.err (!%p801_p10)
}
  0x1d   :  { %s805_s1 = scalar_lea.vmem %s65_s13, 512  ;;  %p810_p12 = scmp.lt.s32.totalorder %s65_s13, %s65_s13 }
  0x1e   :  { %p806_p11 = scmp.ne.s32.totalorder %s65_s13, %s805_s1  ;;  %p811_p13 = scmp.lt.s32.totalorder %s805_s1, %s805_s1 }
  0x20   :  { %p812_p0 = por %p811_p13, %p810_p12 }
  0x22   :  { %p813_p1 = pnand %p812_p0, %p806_p11 }
  0x24   :  { %816 = shalt.err (!%p813_p1)
}
  0x25   :  { %70 = dma.hbm_to_vmem [thread:$0]  %s1200_s5, 512, %s65_s13, [#allocation9], %s960_s27, %s960_s27, %s961_s28  }
  0x26   :  { %s817_s29 = scalar_lea.hbm %s1202_s7, 512 }
  0x27   :  { %p818_p2 = scmp.ne.s32.totalorder %s1202_s7, %s817_s29  ;;  %p821_p3 = scmp.lt.u32.totalorder %s817_s29, %s1202_s7 }
  0x29   :  { %p823_p4 = pnand %p821_p3, %p818_p2 }
  0x2b   :  { %826 = shalt.err (!%p823_p4)
}
  0x2c   :  { %s827_s17 = scalar_lea.vmem %s87_s15, 512  ;;  %p832_p6 = scmp.lt.s32.totalorder %s87_s15, %s87_s15 }
  0x2d   :  { %p828_p5 = scmp.ne.s32.totalorder %s87_s15, %s827_s17  ;;  %p833_p7 = scmp.lt.s32.totalorder %s827_s17, %s827_s17 }
  0x2f   :  { %p834_p8 = por %p833_p7, %p832_p6 }
  0x31   :  { %p835_p9 = pnand %p834_p8, %p828_p5 }
  0x33   :  { %838 = shalt.err (!%p835_p9)
}
  0x34   :  { %92 = dma.hbm_to_vmem [thread:$0]  %s1202_s7, 512, %s87_s15, [#allocation12], %s960_s27, %s960_s27, %s961_s28  }
  0x35   :  { %s964_s19 = smov [#allocation2]   ;;  %s965_s21 = smov [#allocation7]  }
  0x36   :  { %s27_s20 = sshll.u32 %s964_s19, 4  ;;  %s50_s22 = sshll.u32 %s965_s21, 4  ;;  %s28_s20 = int_to_ptr.vmem [resolvable:$true] %s27_s20  ;;  %s51_s22 = int_to_ptr.vmem [resolvable:$true] %s50_s22 }
  0x37   :  { %s839_s18 = scalar_lea.hbm %s1195_s0, 128 }
  0x38   :  { %p840_p10 = scmp.ne.s32.totalorder %s1195_s0, %s839_s18  ;;  %p843_p11 = scmp.lt.u32.totalorder %s839_s18, %s1195_s0 }
  0x3a   :  { %p845_p12 = pnand %p843_p11, %p840_p10 }
  0x3c   :  { %848 = shalt.err (!%p845_p12)
}
  0x3d   :  { %s849_s7 = scalar_lea.vmem %s28_s20, 128  ;;  %p854_p0 = scmp.lt.s32.totalorder %s28_s20, %s28_s20 }
  0x3e   :  { %p850_p13 = scmp.ne.s32.totalorder %s28_s20, %s849_s7  ;;  %p855_p1 = scmp.lt.s32.totalorder %s849_s7, %s849_s7 }
  0x40   :  { %p856_p2 = por %p855_p1, %p854_p0 }
  0x42   :  { %p857_p3 = pnand %p856_p2, %p850_p13 }
  0x44   :  { %860 = shalt.err (!%p857_p3)
}
  0x45   :  { %30 = dma.hbm_to_vmem [thread:$0]  %s1195_s0, 128, %s28_s20, [#allocation3]  }
  0x46   :  { %s861_s16 = scalar_lea.hbm %s1198_s3, 512 }
  0x47   :  { %p862_p4 = scmp.ne.s32.totalorder %s1198_s3, %s861_s16  ;;  %p865_p5 = scmp.lt.u32.totalorder %s861_s16, %s1198_s3 }
  0x49   :  { %p867_p6 = pnand %p865_p5, %p862_p4 }
  0x4b   :  { %870 = shalt.err (!%p867_p6)
}
  0x4c   :  { %s871_s21 = scalar_lea.vmem %s51_s22, 512  ;;  %p876_p8 = scmp.lt.s32.totalorder %s51_s22, %s51_s22 }
  0x4d   :  { %p872_p7 = scmp.ne.s32.totalorder %s51_s22, %s871_s21  ;;  %p877_p9 = scmp.lt.s32.totalorder %s871_s21, %s871_s21 }
  0x4f   :  { %p878_p10 = por %p877_p9, %p876_p8 }
  0x51   :  { %p879_p11 = pnand %p878_p10, %p872_p7 }
  0x53   :  { %882 = shalt.err (!%p879_p11)
}
  0x54   :  { %56 = dma.hbm_to_vmem [thread:$0]  %s1198_s3, 512, %s51_s22, [#allocation6], %s960_s27, %s960_s27, %s961_s28  }
  0x55   :  { %s966_s23 = smov [#allocation10]   ;;  %s967_s18 = smov [#allocation13]  }
  0x56   :  { %s77_s1 = sshll.u32 %s966_s23, 4  ;;  %s99_s24 = sshll.u32 %s967_s18, 4  ;;  %s78_s1 = int_to_ptr.vmem [resolvable:$true] %s77_s1  ;;  %s100_s24 = int_to_ptr.vmem [resolvable:$true] %s99_s24 }
  0x57   :  { %s883_s29 = scalar_lea.hbm %s1201_s6, 16 }
  0x58   :  { %p884_p12 = scmp.ne.s32.totalorder %s1201_s6, %s883_s29  ;;  %p887_p13 = scmp.lt.u32.totalorder %s883_s29, %s1201_s6 }
  0x5a   :  { %p889_p0 = pnand %p887_p13, %p884_p12 }
  0x5c   :  { %892 = shalt.err (!%p889_p0)
}
  0x5d   :  { %s893_s3 = scalar_lea.vmem %s78_s1, 16  ;;  %s897_s27 = scalar_lea.vmem %s78_s1, 32 }
  0x5e   :  { %p894_p1 = scmp.ne.s32.totalorder %s78_s1, %s893_s3  ;;  %p898_p2 = scmp.lt.s32.totalorder %s78_s1, %s78_s1 }
  0x5f   :  { %p899_p3 = scmp.lt.s32.totalorder %s897_s27, %s893_s3 }
  0x61   :  { %p900_p4 = por %p899_p3, %p898_p2 }
  0x63   :  { %p901_p5 = pnand %p900_p4, %p894_p1 }
  0x65   :  { %904 = shalt.err (!%p901_p5)
}
  0x66   :  { %80 = dma.hbm_to_vmem [thread:$0]  %s1201_s6, 16, %s78_s1, [#allocation9]  }
  0x67   :  { %s905_s17 = scalar_lea.hbm %s1203_s8, 16 }
  0x68   :  { %p906_p6 = scmp.ne.s32.totalorder %s1203_s8, %s905_s17  ;;  %p909_p7 = scmp.lt.u32.totalorder %s905_s17, %s1203_s8 }
  0x6a   :  { %p911_p8 = pnand %p909_p7, %p906_p6 }
  0x6c   :  { %914 = shalt.err (!%p911_p8)
}
  0x6d   :  { %s915_s0 = scalar_lea.vmem %s100_s24, 16  ;;  %s919_s20 = scalar_lea.vmem %s100_s24, 32 }
  0x6e   :  { %p916_p9 = scmp.ne.s32.totalorder %s100_s24, %s915_s0  ;;  %p920_p10 = scmp.lt.s32.totalorder %s100_s24, %s100_s24 }
  0x6f   :  { %p921_p11 = scmp.lt.s32.totalorder %s919_s20, %s915_s0 }
  0x71   :  { %p922_p12 = por %p921_p11, %p920_p10 }
  0x73   :  { %p923_p13 = pnand %p922_p12, %p916_p9 }
  0x75   :  { %926 = shalt.err (!%p923_p13)
}
  0x76   :  { %102 = dma.hbm_to_vmem [thread:$0]  %s1203_s8, 16, %s100_s24, [#allocation12]  }
  0x77   :  { %949 = dma.done.wait [#allocation3], 128  }
  0x78   :  { %950 = vsyncadd [#allocation3], 4294967168 }
  0x79   :  { %951 = dma.done.wait [#allocation6], 768  }
  0x7a   :  { %952 = vsyncadd [#allocation6], 4294966528 }
  0x7b   :  { %953 = dma.done.wait [#allocation9], 528  }
  0x7c   :  { %954 = vsyncadd [#allocation9], 4294966768 }
  0x7d   :  { %955 = dma.done.wait [#allocation12], 528  }
  0x7e   :  { %956 = vsyncadd [#allocation12], 4294966768  ;;  %v968_v0 = vmov 0.0|0.0   ;;  %vm969_vm0 = vmmov 0   ;;  %v970_v1 = vmov 0.0   ;;  %v129_v2 = vld [vmem:[#allocation5] sm:$0xff] }
  0x7f   :  { %723 = vmatprep.subr.bf16.mxu0 %v968_v0  ;;  %676 = vmatprep.mubr.msk.f32.mxu0 %vm969_vm0, %v970_v1  ;;  %v130_v3 = vld [vmem:[#allocation5 + $0x8] sm:$0xff]  ;;  %v128_v5 = vld [vmem:[#allocation2] sm:$0xff]  ;;  %vm138_vm1 = vcmask 130048   ;;  %vm212_vm2 = vcmask 261120   ;;  %v228_v16 = vld [vmem:[#allocation7] sm:$0xff] }
  0x80   :  { %726 = vmatprep.subr.bf16.mxu1 %v968_v0  ;;  %687 = vmatprep.mubr.msk.f32.mxu1 %vm969_vm0, %v970_v1  ;;  %v724_v4 = vpack.c.bf16 %v130_v3, %v129_v2  ;;  %v639_v6 = vld [vmem:[%s1197_s2] ss:$0 sm:$0xff]  ;;  %v230_v18 = vld [vmem:[#allocation7 + $0x10] sm:$0xff]  ;;  %v231_v20 = vld [vmem:[#allocation7 + $0x18] sm:$0xff] }
  0x81   :  { %v229_v17 = vld [vmem:[#allocation7 + $0x8] sm:$0xff]  ;;  %v730_v21 = vpack.c.bf16 %v231_v20, %v230_v18  ;;  %v326_v38 = vld [vmem:[#allocation8] sm:$0xff]  ;;  %v328_v40 = vld [vmem:[#allocation8 + $0x10] sm:$0xff] }
  0x82   :  { %725 = vmatpush3.bf16.msra.mxu0 %v724_v4  ;;  %v727_v19 = vpack.c.bf16 %v229_v17, %v228_v16  ;;  %v641_v28 = vld [vmem:[%s1199_s4] ss:$0 sm:$0xff]  ;;  %v329_v42 = vld [vmem:[#allocation8 + $0x18] sm:$0xff]  ;;  %v643_v50 = vld [vmem:[#allocation10] ss:$0 sm:$0xff] }
  0x83   :  { %732 = vmatprep.subr.bf16.mxu0 %v968_v0  ;;  %v327_v39 = vld [vmem:[#allocation8 + $0x8] sm:$0xff]  ;;  %v736_v43 = vpack.c.bf16 %v329_v42, %v328_v40  ;;  %v426_v62 = vld [vmem:[#allocation11 + $0x10] sm:$0xff]  ;;  %v427_v2 = vld [vmem:[#allocation11 + $0x18] sm:$0xff] }
  0x84   :  { %728 = vmatpush3.bf16.msra.mxu1 %v727_v19  ;;  %v733_v41 = vpack.c.bf16 %v327_v39, %v326_v38  ;;  %v424_v60 = vld [vmem:[#allocation11] sm:$0xff]  ;;  %v425_v61 = vld [vmem:[#allocation11 + $0x8] sm:$0xff] }
  0x85   :  { %677 = vmatmul.mubr.msk.f32.vlgmr.msra.gmra.mrb[0].mxu0 %vm138_vm1, %v128_v5  ;;  %729 = vmatprep.subr.bf16.mxu1 %v968_v0  ;;  %v739_v63 = vpack.c.bf16 %v425_v61, %v424_v60  ;;  %v522_v19 = vld [vmem:[%s1204_s9] sm:$0xff]  ;;  %v523_v20 = vld [vmem:[%s1204_s9 + $0x8] sm:$0xff] }
  0x86   :  { %698 = vmatprep.mubr.msk.f32.mxu0 %vm969_vm0, %v970_v1  ;;  %734 = vmatpush3.bf16.msra.mxu0 %v733_v41 }
  0x87   :  { %735 = vmatprep.subr.bf16.mxu0 %v968_v0 }
  0x88   :  { %731 = vmatpush3.bf16.msra.mxu1 %v730_v21  ;;  %v524_v21 = vld [vmem:[%s1204_s9 + $0x10] sm:$0xff] }
  0x89   :  { %738 = vmatprep.subr.bf16.mxu1 %v968_v0 }
  0x8a   :  { %737 = vmatpush3.bf16.msra.mxu0 %v736_v43 }
  0x8b   :  { %744 = vmatprep.subr.bf16.mxu0 %v968_v0 }
 0x158   :  { %v208_v7 = vpop.f32.mrb[0].mxu0 }
 0x159   :  { %v209_v8 = vadd.f32 %v639_v6, %v208_v7  ;;  %v678_v9 = vpop.f32.mrb[1].mxu0 }
 0x15a   :  { %v645_v9 = vld [vmem:[#allocation13] ss:$0 sm:$0xff] }
 0x15b   :  { %v213_v10 = vsel %vm212_vm2, %v209_v8, 0.0 }
 0x15c   :  { %214 = vadd.xlane.f32.xlu0 %v213_v10 }
 0x1e9   :  { %v215_v11 = vpop.xlane.xlu0 %214 }
 0x1ea   :  { %v217_v12 = vmul.f32 0.03125, %v215_v11 }
 0x1ec   :  { %v218_v13 = vsub.f32 %v209_v8, %v217_v12 }
 0x1ee   :  { %v219_v14 = vmul.f32 %v218_v13, %v218_v13 }
 0x1f0   :  { %v220_v15 = vsel %vm212_vm2, %v219_v14, 0.0 }
 0x1f1   :  { %221 = vadd.xlane.f32.xlu0 %v220_v15 }
 0x27e   :  { %v222_v22 = vpop.xlane.xlu0 %221 }
 0x27f   :  { %v223_v23 = vmul.f32 0.03125, %v222_v22  ;;  %v745_v22 = vpack.c.bf16 %v523_v20, %v522_v19 }
 0x281   :  { %v224_v24 = vadd.f32 1e-05, %v223_v23  ;;  %v525_v23 = vld [vmem:[%s1204_s9 + $0x18] sm:$0xff]  ;;  %s971_s9 = smov [#allocation14]  }
 0x283   :  { %763 = vrsqrt.f32 %v224_v24  ;;  %v748_v24 = vpack.c.bf16 %v525_v23, %v524_v21 }
 0x28d   :  { %v764_v25 = vpop.eup %763 }
 0x28e   :  { %v226_v26 = vmul.f32 %v764_v25, %v218_v13 }
 0x290   :  { %v227_v27 = vmax.f32 %v226_v26, 0.0 }
 0x292   :  { %688 = vmatmul.mubr.msk.f32.vlgmr.msra.gmra.mrb[0].mxu1 %vm212_vm2, %v227_v27 }
 0x293   :  { %709 = vmatprep.mubr.msk.f32.mxu1 %vm969_vm0, %v970_v1  ;;  %740 = vmatpush3.bf16.msra.mxu1 %v739_v63 }
 0x294   :  { %741 = vmatprep.subr.bf16.mxu1 %v968_v0 }
 0x365   :  { %v308_v29 = vpop.f32.mrb[0].mxu1 }
 0x366   :  { %v309_v30 = vadd.f32 %v641_v28, %v308_v29  ;;  %v689_v31 = vpop.f32.mrb[1].mxu1 }
 0x367   :  { %v647_v31 = vld [vmem:[%s1205_s10] ss:$0 sm:$0xff]  ;;  %s627_s10 = sshll.u32 %s971_s9, 4  ;;  %s628_s10 = int_to_ptr.vmem [resolvable:$true] %s627_s10 }
 0x368   :  { %v312_v32 = vsel %vm212_vm2, %v309_v30, 0.0  ;;  %s927_s27 = scalar_lea.vmem %s628_s10, 128  ;;  %p932_p1 = scmp.lt.s32.totalorder %s628_s10, %s628_s10 }
 0x369   :  { %313 = vadd.xlane.f32.xlu1 %v312_v32  ;;  %p928_p0 = scmp.ne.s32.totalorder %s628_s10, %s927_s27  ;;  %p933_p2 = scmp.lt.s32.totalorder %s927_s27, %s927_s27 }
 0x36b   :  { %p934_p3 = por %p933_p2, %p932_p1 }
 0x36d   :  { %p935_p4 = pnand %p934_p3, %p928_p0 }
 0x3f6   :  { %v314_v33 = vpop.xlane.xlu1 %313 }
 0x3f7   :  { %v315_v34 = vmul.f32 0.03125, %v314_v33 }
 0x3f9   :  { %v316_v35 = vsub.f32 %v309_v30, %v315_v34 }
 0x3fb   :  { %v317_v36 = vmul.f32 %v316_v35, %v316_v35 }
 0x3fd   :  { %v318_v37 = vsel %vm212_vm2, %v317_v36, 0.0 }
 0x3fe   :  { %319 = vadd.xlane.f32.xlu1 %v318_v37 }
 0x48b   :  { %v320_v44 = vpop.xlane.xlu1 %319 }
 0x48c   :  { %v321_v45 = vmul.f32 0.03125, %v320_v44 }
 0x48e   :  { %v322_v46 = vadd.f32 1e-05, %v321_v45 }
 0x490   :  { %765 = vrsqrt.f32 %v322_v46 }
 0x49a   :  { %v766_v47 = vpop.eup %765 }
 0x49b   :  { %v324_v48 = vmul.f32 %v766_v47, %v316_v35 }
 0x49d   :  { %v325_v49 = vmax.f32 %v324_v48, 0.0 }
 0x49f   :  { %699 = vmatmul.mubr.msk.f32.vlgmr.msra.gmra.mrb[2].mxu0 %vm212_vm2, %v325_v49 }
 0x4a0   :  { %720 = vmatprep.mubr.msk.f32.mxu0 %vm969_vm0, %v970_v1  ;;  %v742_v1 = vpack.c.bf16 %v427_v2, %v426_v62  ;;  %746 = vmatpush3.bf16.msra.mxu0 %v745_v22 }
 0x4a1   :  { %747 = vmatprep.subr.bf16.mxu0 %v968_v0 }
 0x4a2   :  { %743 = vmatpush3.bf16.msra.mxu1 %v742_v1 }
 0x4a4   :  { %749 = vmatpush3.bf16.msra.mxu0 %v748_v24 }
 0x572   :  { %v406_v51 = vpop.f32.mrb[2].mxu0 }
 0x573   :  { %v407_v52 = vadd.f32 %v643_v50, %v406_v51  ;;  %v700_v53 = vpop.f32.mrb[3].mxu0 }
 0x575   :  { %v410_v54 = vsel %vm212_vm2, %v407_v52, 0.0 }
 0x576   :  { %411 = vadd.xlane.f32.xlu0 %v410_v54 }
 0x603   :  { %v412_v55 = vpop.xlane.xlu0 %411 }
 0x604   :  { %v413_v56 = vmul.f32 0.03125, %v412_v55 }
 0x606   :  { %v414_v57 = vsub.f32 %v407_v52, %v413_v56 }
 0x608   :  { %v415_v58 = vmul.f32 %v414_v57, %v414_v57 }
 0x60a   :  { %v416_v59 = vsel %vm212_vm2, %v415_v58, 0.0 }
 0x60b   :  { %417 = vadd.xlane.f32.xlu1 %v416_v59 }
 0x698   :  { %v418_v3 = vpop.xlane.xlu1 %417 }
 0x699   :  { %v419_v4 = vmul.f32 0.03125, %v418_v3 }
 0x69b   :  { %v420_v5 = vadd.f32 1e-05, %v419_v4 }
 0x69d   :  { %767 = vrsqrt.f32 %v420_v5 }
 0x6a7   :  { %v768_v6 = vpop.eup %767 }
 0x6a8   :  { %v422_v7 = vmul.f32 %v768_v6, %v414_v57 }
 0x6aa   :  { %v423_v8 = vmax.f32 %v422_v7, 0.0 }
 0x6ac   :  { %710 = vmatmul.mubr.msk.f32.vlgmr.msra.gmra.mrb[2].mxu1 %vm212_vm2, %v423_v8 }
 0x77f   :  { %v504_v10 = vpop.f32.mrb[2].mxu1 }
 0x780   :  { %v505_v11 = vadd.f32 %v645_v9, %v504_v10  ;;  %v711_v12 = vpop.f32.mrb[3].mxu1 }
 0x782   :  { %v508_v13 = vsel %vm212_vm2, %v505_v11, 0.0 }
 0x783   :  { %509 = vadd.xlane.f32.xlu0 %v508_v13 }
 0x810   :  { %v510_v14 = vpop.xlane.xlu0 %509 }
 0x811   :  { %v511_v15 = vmul.f32 0.03125, %v510_v14 }
 0x813   :  { %v512_v16 = vsub.f32 %v505_v11, %v511_v15 }
 0x815   :  { %v513_v17 = vmul.f32 %v512_v16, %v512_v16 }
 0x817   :  { %v514_v18 = vsel %vm212_vm2, %v513_v17, 0.0 }
 0x818   :  { %515 = vadd.xlane.f32.xlu1 %v514_v18 }
 0x8a5   :  { %v516_v25 = vpop.xlane.xlu1 %515 }
 0x8a6   :  { %v517_v26 = vmul.f32 0.03125, %v516_v25 }
 0x8a8   :  { %v518_v27 = vadd.f32 1e-05, %v517_v26 }
 0x8aa   :  { %769 = vrsqrt.f32 %v518_v27 }
 0x8b4   :  { %v770_v28 = vpop.eup %769 }
 0x8b5   :  { %v520_v29 = vmul.f32 %v770_v28, %v512_v16 }
 0x8b7   :  { %v521_v30 = vmax.f32 %v520_v29, 0.0 }
 0x8b9   :  { %721 = vmatmul.mubr.msk.f32.vlgmr.msra.gmra.mrb[4].mxu0 %vm212_vm2, %v521_v30 }
 0x98c   :  { %v602_v32 = vpop.f32.mrb[4].mxu0 }
 0x98d   :  { %v603_v33 = vadd.f32 %v647_v31, %v602_v32  ;;  %v722_v34 = vpop.f32.mrb[5].mxu0 }
 0x98f   :  { %v606_v35 = vsel %vm212_vm2, %v603_v33, 0.0 }
 0x990   :  { %607 = vadd.xlane.f32.xlu0 %v606_v35 }
 0xa1d   :  { %v608_v0 = vpop.xlane.xlu0 %607 }
 0xa1e   :  { %v609_v36 = vmul.f32 0.03125, %v608_v0 }
 0xa20   :  { %v610_v37 = vsub.f32 %v603_v33, %v609_v36 }
 0xa22   :  { %v611_v38 = vmul.f32 %v610_v37, %v610_v37 }
 0xa24   :  { %v612_v39 = vsel %vm212_vm2, %v611_v38, 0.0 }
 0xa25   :  { %613 = vadd.xlane.f32.xlu1 %v612_v39 }
 0xab2   :  { %v614_v40 = vpop.xlane.xlu1 %613 }
 0xab3   :  { %v615_v41 = vmul.f32 0.03125, %v614_v40 }
 0xab5   :  { %v616_v42 = vadd.f32 1e-05, %v615_v41 }
 0xab7   :  { %771 = vrsqrt.f32 %v616_v42 }
 0xac1   :  { %v772_v43 = vpop.eup %771 }
 0xac2   :  { %v618_v44 = vmul.f32 %v772_v43, %v610_v37 }
 0xac4   :  { %v619_v45 = vmax.f32 %v618_v44, 0.0 }
 0xac6   :  { %620 = vst.msk [vmem:[#allocation14] sm:$0xff] %vm212_vm2, %v619_v45 }
 0xac7   :  { %938 = shalt.err (!%p935_p4)
}
 0xac8   :  { %s939_s14 = scalar_lea.hbm %s1206_s11, 128 }
 0xac9   :  { %p940_p5 = scmp.ne.s32.totalorder %s1206_s11, %s939_s14  ;;  %p943_p6 = scmp.lt.u32.totalorder %s939_s14, %s1206_s11 }
 0xacb   :  { %p945_p7 = pnand %p943_p6, %p940_p5 }
 0xacd   :  { %948 = shalt.err (!%p945_p7)
}
 0xace   :  { %630 = dma.vmem_to_hbm [thread:$0]  %s628_s10, 128, %s1206_s11, [#allocation4]  }
 0xacf   :  { %957 = dma.done.wait [#allocation4], 128  }
 0xad0   :  { %958 = vsyncadd [#allocation4], 4294967168 }
 0xad1   :  { %634 = vsyncpa [#allocation3], 1 }
 0xad2   :  { %635 = vsyncpa [#allocation6], 1 }
 0xad3   :  { %636 = vsyncpa [#allocation9], 1 }
 0xad4   :  { %637 = vsyncpa [#allocation12], 1 }
 0xad5   :  { %638 = vsyncpa [#allocation4], 1 }

</bundles_post_ra>
